<compile_context>
chip_gen: v5e
topology: v5e:2x2
jax: 0.10.0
libtpu: 0.0.40
codegen_flags: <defaults>
</compile_context>

<pallas_src>
import functools

import jax
import jax.numpy as jnp
from jax import lax
from jax.experimental import pallas as pl
from jax.experimental.pallas import tpu as pltpu


# ----------------------------------------------------------------------------- kernel
def _head_kernel(x_ref, w_ref, o1_ref, o2_ref, o3_ref, *, eps, out_dim):
    # Row-wise L2 normalize in f32.  F.normalize(x, dim=-1, p=2) is
    # x / max(||x||, eps) == x * rsqrt(max(||x||^2, eps^2)).
    x = x_ref[...].astype(jnp.float32)                       # (TB, D1)
    sumsq = jnp.sum(x * x, axis=-1, keepdims=True)           # (TB, 1)
    inv = lax.rsqrt(jnp.maximum(sumsq, eps * eps))           # EUP rsqrt
    xn = (x * inv).astype(w_ref.dtype)                       # bf16 MXU operand

    # One fused MXU matmul against the packed slab
    #   [ W1^T | W2^T (K zero-padded) | W3^T (K zero-padded) | 0-pad lanes ].
    acc = jnp.dot(xn, w_ref[...], preferred_element_type=jnp.float32)  # (TB, n_pad)

    # Split the accumulator (VMEM-local, cheap) into the three real outputs;
    # writeback only touches the useful 3*out_dim columns.
    o1_ref[...] = acc[:, 0 * out_dim:1 * out_dim].astype(o1_ref.dtype)
    o2_ref[...] = acc[:, 1 * out_dim:2 * out_dim].astype(o2_ref.dtype)
    o3_ref[...] = acc[:, 2 * out_dim:3 * out_dim].astype(o3_ref.dtype)


# ----------------------------------------------------------------------------- weight packing
def pack_weights(w1, w2, w3, *, dtype=jnp.bfloat16):
    """Pack nn.Linear weights (out_dim, d_i) into one lane-dense (d1, n_pad) slab.

    Call ONCE at parameter-load time (not per forward call) so no transposes /
    pads / casts are emitted on the hot path.  Weights are stored in bf16
    (native MXU input on v5e/v6e/v7x; halves HBM DMA and VMEM residency).
    Returns (w_cat, out_dim, n_pad).
    """
    out_dim, d1 = w1.shape
    d2 = w2.shape[1]
    d3 = w3.shape[1]
    assert w2.shape[0] == out_dim and w3.shape[0] == out_dim
    assert d2 <= d1 and d3 <= d1

    n = 3 * out_dim
    n_pad = ((n + 127) // 128) * 128            # lane-dense weight columns

    def seg(w, din):
        wt = w.T                                             # (din, out_dim)
        return jnp.pad(wt, ((0, d1 - din), (0, 0)))          # zero-pad K up to d1

    w_cat = jnp.concatenate([seg(w1, d1), seg(w2, d2), seg(w3, d3)], axis=1)
    w_cat = jnp.pad(w_cat, ((0, 0), (0, n_pad - n)))
    return w_cat.astype(dtype), out_dim, n_pad


# ----------------------------------------------------------------------------- wrapper
def linear_head_multi_manifold(x, w_cat, out_dim, *, out_dtype=None,
                               max_block_b=8192, eps=1e-12):
    """x: (B, d1); w_cat: (d1, n_pad) packed via pack_weights()."""
    B, d1 = x.shape
    d1_w, n_pad = w_cat.shape
    assert d1_w == d1 and n_pad % 128 == 0 and n_pad >= 3 * out_dim
    out_dtype = x.dtype if out_dtype is None else out_dtype

    in_bytes = x.dtype.itemsize
    w_bytes = w_cat.dtype.itemsize
    out_bytes = jnp.dtype(out_dtype).itemsize

    # --- per-generation VMEM budget ------------------------------------------
    MiB = 1024 * 1024
    try:
        vmem_phys = int(getattr(pltpu.get_tpu_info(), "vmem_capacity_bytes",
                                64 * MiB))
    except Exception:
        vmem_phys = 64 * MiB                      # unknown -> assume v7x (64 MiB/TC)
    if vmem_phys >= 128 * MiB:                    # v5e / v6e: 128 MiB physical VMEM
        budget, limit_cap = 96 * MiB, 110 * MiB
    else:                                         # v7x (or unknown): leave headroom
        budget, limit_cap = 40 * MiB, 52 * MiB

    # Sublane alignment for the batch (second-minor) axis.
    row_align = 8 if in_bytes >= 4 else (16 if in_bytes == 2 else 32)

    def _round_rows(t):
        return max(row_align, ((t + row_align - 1) // row_align) * row_align)

    def _vmem_est(t, w_bufs):
        return (2 * t * d1 * in_bytes                 # double-buffered x tiles
                + 2 * 3 * t * out_dim * out_bytes     # double-buffered output tiles
                + t * n_pad * 4                       # f32 matmul accumulator
                + w_bufs * d1 * n_pad * w_bytes)      # resident packed weights

    def _pick_tile(w_bufs):
        # Grow the batch tile toward the VMEM budget (budget is checked even
        # in the single-tile tb == B case), then keep >=2 grid steps when B
        # permits (pipelining + both v7x TensorCores busy).
        fixed = w_bufs * d1 * n_pad * w_bytes
        per_row = 2 * d1 * in_bytes + 2 * 3 * out_dim * out_bytes + n_pad * 4
        avail = max(budget - fixed, per_row * row_align)
        max_tb = max(row_align, (avail // per_row) // row_align * row_align)
        max_tb = min(max_tb, max_block_b)
        min_steps = 2 if B >= 2 * row_align else 1
        steps = max(-(-B // max_tb), min_steps)
        tb = min(max_tb, _round_rows(-(-B // steps)))
        if tb >= B:
            tb = B                                 # full-dim block: always legal,
        return tb                                  # and no padded rows at all

    def _run(single_buffer_weights):
        w_bufs = 1 if single_buffer_weights else 2
        tb = _pick_tile(w_bufs)
        grid = (pl.cdiv(B, tb),)
        vmem_limit = int(min(limit_cap,
                             max(32 * MiB, int(1.25 * _vmem_est(tb, w_bufs)))))

        w_kwargs = ({"pipeline_mode": pl.Buffered(1)}
                    if single_buffer_weights else {})
        kernel = functools.partial(_head_kernel, eps=eps, out_dim=out_dim)
        cost = pl.CostEstimate(
            flops=2 * B * d1 * n_pad,
            transcendentals=B,
            bytes_accessed=(B * d1 * in_bytes
                            + d1 * n_pad * w_bytes
                            + 3 * B * out_dim * out_bytes))

        out_block = pl.BlockSpec((tb, out_dim), lambda i: (i, 0))
        return pl.pallas_call(
            kernel,
            out_shape=(jax.ShapeDtypeStruct((B, out_dim), out_dtype),
                       jax.ShapeDtypeStruct((B, out_dim), out_dtype),
                       jax.ShapeDtypeStruct((B, out_dim), out_dtype)),
            grid_spec=pltpu.PrefetchScalarGridSpec(
                num_scalar_prefetch=0,
                grid=grid,
                in_specs=[
                    pl.BlockSpec((tb, d1), lambda i: (i, 0)),              # x batch tile
                    pl.BlockSpec((d1, n_pad), lambda i: (0, 0), **w_kwargs),  # resident weights
                ],
                out_specs=(out_block, out_block, out_block),
            ),
            compiler_params=pltpu.CompilerParams(
                dimension_semantics=("parallel",),
                vmem_limit_bytes=vmem_limit),
            cost_estimate=cost,
        )(x, w_cat)

    try:
        # Single-buffer the constant weight block (it is never re-DMA'd).
        return _run(True)
    except Exception:
        # pl.Buffered(1) / pipeline_mode unsupported on this jax version:
        # fall back to default double buffering (tile re-picked for 2 buffers).
        return _run(False)


# ----------------------------------------------------------------------------- demo / self-test
if __name__ == "__main__":
    key = jax.random.PRNGKey(0)
    B = 8
    manifolds = (32, 16, 8)     # (dim_manifold1, dim_manifold2, dim_manifold3)
    out_dim = 16

    kx, k1, k2, k3 = jax.random.split(key, 4)
    x = jax.random.normal(kx, (B, manifolds[0]), jnp.float32)
    # nn.Linear(dim_i, out_dim, bias=False) weights: (out_dim, dim_i)
    w1 = 0.02 * jax.random.normal(k1, (out_dim, manifolds[0]), jnp.float32)
    w2 = 0.02 * jax.random.normal(k2, (out_dim, manifolds[1]), jnp.float32)
    w3 = 0.02 * jax.random.normal(k3, (out_dim, manifolds[2]), jnp.float32)

    # One-time weight packing (parameter prep, off the hot path), bf16 slab.
    w_cat, out_dim_p, n_pad = pack_weights(w1, w2, w3)

    out1, out2, out3 = jax.block_until_ready(
        linear_head_multi_manifold(x, w_cat, out_dim_p))

    # Pure-JAX f32 reference (weights are bf16 in the kernel -> loosened tol).
    xn = x / jnp.maximum(jnp.linalg.norm(x, axis=-1, keepdims=True), 1e-12)
    r1 = xn @ w1.T
    r2 = xn[:, :manifolds[1]] @ w2.T
    r3 = xn[:, :manifolds[2]] @ w3.T
    assert jnp.allclose(out1, r1, atol=3e-3, rtol=3e-3), "out1 mismatch"
    assert jnp.allclose(out2, r2, atol=3e-3, rtol=3e-3), "out2 mismatch"
    assert jnp.allclose(out3, r3, atol=3e-3, rtol=3e-3), "out3 mismatch"

    print("KERNEL_OK")
</pallas_src>

<mosaic_0001>
module attributes {stable_mosaic.version = 11 : i64} {
  func.func @_head_kernel(%arg0: i32, %arg1: memref<8x32xf32, #tpu.memory_space<vmem>>, %arg2: memref<32x128xbf16, #tpu.memory_space<vmem>>, %arg3: memref<8x16xf32, #tpu.memory_space<vmem>>, %arg4: memref<8x16xf32, #tpu.memory_space<vmem>>, %arg5: memref<8x16xf32, #tpu.memory_space<vmem>>) attributes {dimension_semantics = [#tpu.dimension_semantics<parallel>], iteration_bounds = array<i64: 1>, scalar_prefetch = 0 : i64, scratch_operands = 0 : i64, tpu.core_type = #tpu.core_type<tc>, window_params = [{transform_indices = @transform_0, window_bounds = array<i64: 8, 32>}, {pipeline_mode = #tpu.pipeline_mode<synchronous>, transform_indices = @transform_1, window_bounds = array<i64: 32, 128>}, {transform_indices = @transform_2, window_bounds = array<i64: 8, 16>}, {transform_indices = @transform_3, window_bounds = array<i64: 8, 16>}, {transform_indices = @transform_4, window_bounds = array<i64: 8, 16>}]} {
    %c0 = arith.constant 0 : index
    %c0_0 = arith.constant 0 : index
    %0 = vector.load %arg1[%c0, %c0_0] : memref<8x32xf32, #tpu.memory_space<vmem>>, vector<8x32xf32>
    %1 = arith.mulf %0, %0 : vector<8x32xf32>
    %cst = arith.constant dense<0.000000e+00> : vector<8xf32>
    %2 = vector.multi_reduction <add>, %1, %cst [1] : vector<8x32xf32> to vector<8xf32>
    %3 = vector.shape_cast %2 : vector<8xf32> to vector<8x1xf32>
    %cst_1 = arith.constant 1.000000e-24 : f32
    %4 = vector.broadcast %cst_1 : f32 to vector<8x1xf32>
    %5 = arith.maximumf %3, %4 : vector<8x1xf32>
    %6 = math.rsqrt %5 : vector<8x1xf32>
    %7 = vector.broadcast %6 : vector<8x1xf32> to vector<8x32xf32>
    %8 = arith.mulf %0, %7 : vector<8x32xf32>
    %9 = arith.truncf %8 : vector<8x32xf32> to vector<8x32xbf16>
    %c0_2 = arith.constant 0 : index
    %c0_3 = arith.constant 0 : index
    %10 = vector.load %arg2[%c0_2, %c0_3] : memref<32x128xbf16, #tpu.memory_space<vmem>>, vector<32x128xbf16>
    %cst_4 = arith.constant dense<0.000000e+00> : vector<8x128xf32>
    %11 = tpu.matmul %9, %10, %cst_4 {dimension_numbers = #tpu.dot_dimension_numbers<[1], [0], [0], [1], [0, 0, 1, 1], [], []>} : vector<8x32xbf16>, vector<32x128xbf16>, vector<8x128xf32> -> vector<8x128xf32>
    %12 = vector.extract_strided_slice %11 {offsets = [0, 0], sizes = [8, 16], strides = [1, 1]} : vector<8x128xf32> to vector<8x16xf32>
    %c0_5 = arith.constant 0 : index
    %c0_6 = arith.constant 0 : index
    %13 = vector.load %arg3[%c0_5, %c0_6] : memref<8x16xf32, #tpu.memory_space<vmem>>, vector<8x16xf32>
    tpu.vector_store %arg3[%c0_5, %c0_6], %12 {strides = array<i32>} : memref<8x16xf32, #tpu.memory_space<vmem>>, vector<8x16xf32>,
    %14 = vector.extract_strided_slice %11 {offsets = [0, 16], sizes = [8, 16], strides = [1, 1]} : vector<8x128xf32> to vector<8x16xf32>
    %c0_7 = arith.constant 0 : index
    %c0_8 = arith.constant 0 : index
    %15 = vector.load %arg4[%c0_7, %c0_8] : memref<8x16xf32, #tpu.memory_space<vmem>>, vector<8x16xf32>
    tpu.vector_store %arg4[%c0_7, %c0_8], %14 {strides = array<i32>} : memref<8x16xf32, #tpu.memory_space<vmem>>, vector<8x16xf32>,
    %16 = vector.extract_strided_slice %11 {offsets = [0, 32], sizes = [8, 16], strides = [1, 1]} : vector<8x128xf32> to vector<8x16xf32>
    %c0_9 = arith.constant 0 : index
    %c0_10 = arith.constant 0 : index
    %17 = vector.load %arg5[%c0_9, %c0_10] : memref<8x16xf32, #tpu.memory_space<vmem>>, vector<8x16xf32>
    tpu.vector_store %arg5[%c0_9, %c0_10], %16 {strides = array<i32>} : memref<8x16xf32, #tpu.memory_space<vmem>>, vector<8x16xf32>,
    return
  }
  func.func @transform_0(%arg0: i32) -> (i32, i32) {
    %c0_i32 = arith.constant 0 : i32
    %c0_i32_0 = arith.constant 0 : i32
    return %arg0, %c0_i32 : i32, i32
  }
  func.func @transform_1(%arg0: i32) -> (i32, i32) {
    %c0_i32 = arith.constant 0 : i32
    %c0_i32_0 = arith.constant 0 : i32
    %c0_i32_1 = arith.constant 0 : i32
    return %c0_i32, %c0_i32_0 : i32, i32
  }
  func.func @transform_2(%arg0: i32) -> (i32, i32) {
    %c0_i32 = arith.constant 0 : i32
    %c0_i32_0 = arith.constant 0 : i32
    return %arg0, %c0_i32 : i32, i32
  }
  func.func @transform_3(%arg0: i32) -> (i32, i32) {
    %c0_i32 = arith.constant 0 : i32
    %c0_i32_0 = arith.constant 0 : i32
    return %arg0, %c0_i32 : i32, i32
  }
  func.func @transform_4(%arg0: i32) -> (i32, i32) {
    %c0_i32 = arith.constant 0 : i32
    %c0_i32_0 = arith.constant 0 : i32
    return %arg0, %c0_i32 : i32, i32
  }
}

module attributes {stable_mosaic.version = 11 : i64} {
  func.func @_head_kernel(%arg0: i32, %arg1: memref<8x32xf32, #tpu.memory_space<vmem>>, %arg2: memref<32x128xbf16, #tpu.memory_space<vmem>>, %arg3: memref<8x16xf32, #tpu.memory_space<vmem>>, %arg4: memref<8x16xf32, #tpu.memory_space<vmem>>, %arg5: memref<8x16xf32, #tpu.memory_space<vmem>>) attributes {dimension_semantics = [#tpu.dimension_semantics<parallel>], iteration_bounds = array<i64: 1>, scalar_prefetch = 0 : i64, scratch_operands = 0 : i64, tpu.core_type = #tpu.core_type<tc>, window_params = [{transform_indices = @transform_0, window_bounds = array<i64: 8, 32>}, {pipeline_mode = #tpu.pipeline_mode<synchronous>, transform_indices = @transform_1, window_bounds = array<i64: 32, 128>}, {transform_indices = @transform_2, window_bounds = array<i64: 8, 16>}, {transform_indices = @transform_3, window_bounds = array<i64: 8, 16>}, {transform_indices = @transform_4, window_bounds = array<i64: 8, 16>}]} {
    %c0 = arith.constant 0 : index
    %c0_0 = arith.constant 0 : index
    %0 = vector.load %arg1[%c0, %c0_0] : memref<8x32xf32, #tpu.memory_space<vmem>>, vector<8x32xf32>
    %1 = arith.mulf %0, %0 : vector<8x32xf32>
    %cst = arith.constant dense<0.000000e+00> : vector<8xf32>
    %2 = vector.multi_reduction <add>, %1, %cst [1] : vector<8x32xf32> to vector<8xf32>
    %3 = vector.shape_cast %2 : vector<8xf32> to vector<8x1xf32>
    %cst_1 = arith.constant 1.000000e-24 : f32
    %4 = vector.broadcast %cst_1 : f32 to vector<8x1xf32>
    %5 = arith.maximumf %3, %4 : vector<8x1xf32>
    %6 = math.rsqrt %5 : vector<8x1xf32>
    %7 = vector.broadcast %6 : vector<8x1xf32> to vector<8x32xf32>
    %8 = arith.mulf %0, %7 : vector<8x32xf32>
    %9 = arith.truncf %8 : vector<8x32xf32> to vector<8x32xbf16>
    %c0_2 = arith.constant 0 : index
    %c0_3 = arith.constant 0 : index
    %10 = vector.load %arg2[%c0_2, %c0_3] : memref<32x128xbf16, #tpu.memory_space<vmem>>, vector<32x128xbf16>
    %cst_4 = arith.constant dense<0.000000e+00> : vector<8x128xf32>
    %11 = tpu.matmul %9, %10, %cst_4 {dimension_numbers = #tpu.dot_dimension_numbers<[1], [0], [0], [1], [0, 0, 1, 1], [], []>} : vector<8x32xbf16>, vector<32x128xbf16>, vector<8x128xf32> -> vector<8x128xf32>
    %12 = vector.extract_strided_slice %11 {offsets = [0, 0], sizes = [8, 16], strides = [1, 1]} : vector<8x128xf32> to vector<8x16xf32>
    %c0_5 = arith.constant 0 : index
    %c0_6 = arith.constant 0 : index
    %13 = vector.load %arg3[%c0_5, %c0_6] : memref<8x16xf32, #tpu.memory_space<vmem>>, vector<8x16xf32>
    tpu.vector_store %arg3[%c0_5, %c0_6], %12 {strides = array<i32>} : memref<8x16xf32, #tpu.memory_space<vmem>>, vector<8x16xf32>,
    %14 = vector.extract_strided_slice %11 {offsets = [0, 16], sizes = [8, 16], strides = [1, 1]} : vector<8x128xf32> to vector<8x16xf32>
    %c0_7 = arith.constant 0 : index
    %c0_8 = arith.constant 0 : index
    %15 = vector.load %arg4[%c0_7, %c0_8] : memref<8x16xf32, #tpu.memory_space<vmem>>, vector<8x16xf32>
    tpu.vector_store %arg4[%c0_7, %c0_8], %14 {strides = array<i32>} : memref<8x16xf32, #tpu.memory_space<vmem>>, vector<8x16xf32>,
    %16 = vector.extract_strided_slice %11 {offsets = [0, 32], sizes = [8, 16], strides = [1, 1]} : vector<8x128xf32> to vector<8x16xf32>
    %c0_9 = arith.constant 0 : index
    %c0_10 = arith.constant 0 : index
    %17 = vector.load %arg5[%c0_9, %c0_10] : memref<8x16xf32, #tpu.memory_space<vmem>>, vector<8x16xf32>
    tpu.vector_store %arg5[%c0_9, %c0_10], %16 {strides = array<i32>} : memref<8x16xf32, #tpu.memory_space<vmem>>, vector<8x16xf32>,
    return
  }
  func.func @transform_0(%arg0: i32) -> (i32, i32) {
    %c0_i32 = arith.constant 0 : i32
    %c0_i32_0 = arith.constant 0 : i32
    return %arg0, %c0_i32 : i32, i32
  }
  func.func @transform_1(%arg0: i32) -> (i32, i32) {
    %c0_i32 = arith.constant 0 : i32
    %c0_i32_0 = arith.constant 0 : i32
    %c0_i32_1 = arith.constant 0 : i32
    return %c0_i32, %c0_i32_0 : i32, i32
  }
  func.func @transform_2(%arg0: i32) -> (i32, i32) {
    %c0_i32 = arith.constant 0 : i32
    %c0_i32_0 = arith.constant 0 : i32
    return %arg0, %c0_i32 : i32, i32
  }
  func.func @transform_3(%arg0: i32) -> (i32, i32) {
    %c0_i32 = arith.constant 0 : i32
    %c0_i32_0 = arith.constant 0 : i32
    return %arg0, %c0_i32 : i32, i32
  }
  func.func @transform_4(%arg0: i32) -> (i32, i32) {
    %c0_i32 = arith.constant 0 : i32
    %c0_i32_0 = arith.constant 0 : i32
    return %arg0, %c0_i32 : i32, i32
  }
}

</mosaic_0001>

<bundles_post_ra>
// kernel: tpu_custom_call.1
= control target key start
LH: loop header
LB: loop body
LE: loop exit
PB: predicated region body
PF: predicated region fallthrough
CT: control target
= control target key end

     0   :  { %10 = vsyncpa [#allocation3], 0  ;;  %s362_s0 = inlined_call_operand.hbm [shape: f32[8,32], index: 0, kind: input, shape index: {}]   ;;  %s363_s1 = inlined_call_operand.hbm [shape: bf16[32,128], index: 1, kind: input, shape index: {}]   ;;  %s364_s2 = inlined_call_operand.hbm [shape: f32[8,16], index: 2, kind: output, shape index: {0}]   ;;  %s365_s3 = inlined_call_operand.hbm [shape: f32[8,16], index: 3, kind: output, shape index: {1}]   ;;  %s366_s4 = inlined_call_operand.hbm [shape: f32[8,16], index: 4, kind: output, shape index: {2}]  }
   0x1   :  { %11 = vsyncpa [#allocation6], 0 }
   0x2   :  { %12 = vsyncpa [#allocation4], 0 }
   0x3   :  { %13 = vsyncpa [#allocation9], 0  ;;  %s19_s17 = sshll.u32 %s362_s0, 4  ;;  %s308_s18 = smov [#allocation2]   ;;  %s20_s17 = int_to_ptr.hbm [resolvable:$true] %s19_s17 }
   0x4   :  { %s21_s19 = sshll.u32 %s308_s18, 4  ;;  %s29_s22 = sshll.u32 %s363_s1, 4  ;;  %s22_s19 = int_to_ptr.vmem [resolvable:$true] %s21_s19  ;;  %s30_s22 = int_to_ptr.hbm [resolvable:$true] %s29_s22 }
   0x5   :  { %24 = dma.hbm_to_vmem [thread:$0]  %s20_s17, 128, %s22_s19, [#allocation3]  }
   0x6   :  { %s309_s23 = smov [#allocation5]   ;;  %s310_s25 = smov 64  }
   0x7   :  { %s31_s24 = sshll.u32 %s309_s23, 4  ;;  %s311_s26 = smov 4   ;;  %s32_s24 = int_to_ptr.vmem [resolvable:$true] %s31_s24 }
   0x8   :  { %37 = dma.hbm_to_vmem [thread:$0]  %s30_s22, 256, %s32_s24, [#allocation6], %s310_s25, %s310_s25, %s311_s26  }
   0x9   :  { %300 = dma.done.wait [#allocation3], 128  }
   0xa   :  { %301 = vsyncadd [#allocation3], 4294967168 }
   0xb   :  { %302 = dma.done.wait [#allocation6], 256  }
   0xc   :  { %303 = vsyncadd [#allocation6], 4294967040  ;;  %v47_v0 = vld [vmem:[#allocation2] sm:$0xff]  ;;  %vm49_vm0 = vcmask 261120   ;;  %v168_v3 = vld [vmem:[#allocation5 + $0x8] sm:$0xff]  ;;  %s312_s0 = smov [#allocation7]  }
   0xd   :  { %v48_v1 = vmul.f32 %v47_v0, %v47_v0  ;;  %91 = vmatpush.bf16.msra.mxu0 %v168_v3  ;;  %v167_v4 = vld [vmem:[#allocation5] sm:$0xff]  ;;  %s114_s1 = sshll.u32 %s312_s0, 4  ;;  %s116_s29 = sshll.u32 %s364_s2, 4  ;;  %vm98_vm4 = vcmask 130048   ;;  %s115_s1 = int_to_ptr.vmem [resolvable:$true] %s114_s1  ;;  %s117_s29 = int_to_ptr.hbm [resolvable:$true] %s116_s29 }
   0xe   :  { %s313_s30 = smov 96   ;;  %s314_s5 = smov 112  }
   0xf   :  { %v50_v2 = vsel %vm49_vm0, %v48_v1, 0.0  ;;  %s315_s6 = smov [#allocation8]   ;;  %s127_s10 = sshll.u32 %s365_s3, 4  ;;  %s128_s10 = int_to_ptr.hbm [resolvable:$true] %s127_s10 }
  0x10   :  { %51 = vadd.xlane.f32.xlu0 %v50_v2  ;;  %s125_s7 = sshll.u32 %s315_s6, 4  ;;  %s316_s11 = smov [#allocation10]   ;;  %s126_s7 = int_to_ptr.vmem [resolvable:$true] %s125_s7 }
  0x11   :  { %92 = vmatpush.bf16.msra.mxu0 %v167_v4  ;;  %s136_s2 = sshll.u32 %s316_s11, 4  ;;  %s138_s14 = sshll.u32 %s366_s4, 4  ;;  %s137_s2 = int_to_ptr.vmem [resolvable:$true] %s136_s2  ;;  %s139_s14 = int_to_ptr.hbm [resolvable:$true] %s138_s14 }
  0x83   :  { %v52_v5 = vpop.xlane.xlu0 %51 }
  0x84   :  { %v53_v6 = vmax.f32 %v52_v5, 1e-24 }
  0x86   :  { %178 = vrsqrt.f32 %v53_v6  ;;  %vm60_vm2 = vweird.f32 %v53_v6 }
  0x8c   :  { %v179_v7 = vpop.eup %178 }
  0x8d   :  { %v55_v8 = vmul.f32 %v179_v7, %v53_v6  ;;  %vm61_vm1 = vweird.f32 %v179_v7 }
  0x8e   :  { %vm62_vm3 = vmor %vm60_vm2, %vm61_vm1 }
  0x8f   :  { %v56_v9 = vmul.f32 %v179_v7, %v55_v8 }
  0x91   :  { %v57_v10 = vmul.f32 0.5, %v56_v9 }
  0x93   :  { %v58_v11 = vsub.f32 1.5, %v57_v10 }
  0x95   :  { %v59_v12 = vmul.f32 %v179_v7, %v58_v11 }
  0x97   :  { %v63_v13 = vsel %vm62_vm3, %v179_v7, %v59_v12 }
  0x98   :  { %v64_v14 = vmul.f32 %v63_v13, %v47_v0 }
  0x9a   :  { %v65_v15 = vpack.c.bf16 %v64_v14, %v64_v14 }
  0x9c   :  { %166 = vmatmul.msk.bf16.vlgmr.msra.gmra.mxu0 %vm49_vm0, %v65_v15 }
 0x119   :  { %v94_v16 = vpop.f32.mrf.mxu0 }
 0x11a   :  { %105 = vrot.lane.b32.xlu1 %v94_v16, %s313_s30  ;;  %101 = vrot.lane.b32.xlu0 %v94_v16, %s314_s5  ;;  %99 = vst.msk [vmem:[#allocation7] sm:$0xff] %vm98_vm4, %v94_v16 }
 0x11b   :  { %119 = dma.vmem_to_hbm [thread:$0]  %s115_s1, 128, %s117_s29, [#allocation4]  }
 0x121   :  { %v96_v17 = vpop.f32.mrf.mxu0 }
 0x18c   :  { %v106_v18 = vpop.permute.xlu1 %105  ;;  %v102_v19 = vpop.permute.xlu0 %101 }
 0x18d   :  { %108 = vst.msk [vmem:[#allocation10] sm:$0xff] %vm98_vm4, %v106_v18 }
 0x18e   :  { %104 = vst.msk [vmem:[#allocation8] sm:$0xff] %vm98_vm4, %v102_v19 }
 0x18f   :  { %130 = dma.vmem_to_hbm [thread:$0]  %s126_s7, 128, %s128_s10, [#allocation9]  }
 0x190   :  { %141 = dma.vmem_to_hbm [thread:$0]  %s137_s2, 128, %s139_s14, [#allocation9]  }
 0x191   :  { %304 = dma.done.wait [#allocation4], 128  }
 0x192   :  { %305 = vsyncadd [#allocation4], 4294967168 }
 0x193   :  { %306 = dma.done.wait [#allocation9], 256  }
 0x194   :  { %307 = vsyncadd [#allocation9], 4294967040 }
 0x195   :  { %154 = vsyncpa [#allocation3], 1 }
 0x196   :  { %155 = vsyncpa [#allocation6], 1 }
 0x197   :  { %156 = vsyncpa [#allocation4], 1 }
 0x198   :  { %157 = vsyncpa [#allocation9], 1 }

// kernel: tpu_custom_call.1
= control target key start
LH: loop header
LB: loop body
LE: loop exit
PB: predicated region body
PF: predicated region fallthrough
CT: control target
= control target key end

     0   :  { %10 = vsyncpa [#allocation3], 0  ;;  %s362_s0 = inlined_call_operand.hbm [shape: f32[8,32], index: 0, kind: input, shape index: {}]   ;;  %s363_s1 = inlined_call_operand.hbm [shape: bf16[32,128], index: 1, kind: input, shape index: {}]   ;;  %s364_s2 = inlined_call_operand.hbm [shape: f32[8,16], index: 2, kind: output, shape index: {0}]   ;;  %s365_s3 = inlined_call_operand.hbm [shape: f32[8,16], index: 3, kind: output, shape index: {1}]   ;;  %s366_s4 = inlined_call_operand.hbm [shape: f32[8,16], index: 4, kind: output, shape index: {2}]  }
   0x1   :  { %11 = vsyncpa [#allocation6], 0 }
   0x2   :  { %12 = vsyncpa [#allocation4], 0 }
   0x3   :  { %13 = vsyncpa [#allocation9], 0  ;;  %s19_s17 = sshll.u32 %s362_s0, 4  ;;  %s308_s18 = smov [#allocation2]   ;;  %s20_s17 = int_to_ptr.hbm [resolvable:$true] %s19_s17 }
   0x4   :  { %s21_s19 = sshll.u32 %s308_s18, 4  ;;  %s29_s22 = sshll.u32 %s363_s1, 4  ;;  %s22_s19 = int_to_ptr.vmem [resolvable:$true] %s21_s19  ;;  %s30_s22 = int_to_ptr.hbm [resolvable:$true] %s29_s22 }
   0x5   :  { %24 = dma.hbm_to_vmem [thread:$0]  %s20_s17, 128, %s22_s19, [#allocation3]  }
   0x6   :  { %s309_s23 = smov [#allocation5]   ;;  %s310_s25 = smov 64  }
   0x7   :  { %s31_s24 = sshll.u32 %s309_s23, 4  ;;  %s311_s26 = smov 4   ;;  %s32_s24 = int_to_ptr.vmem [resolvable:$true] %s31_s24 }
   0x8   :  { %37 = dma.hbm_to_vmem [thread:$0]  %s30_s22, 256, %s32_s24, [#allocation6], %s310_s25, %s310_s25, %s311_s26  }
   0x9   :  { %300 = dma.done.wait [#allocation3], 128  }
   0xa   :  { %301 = vsyncadd [#allocation3], 4294967168 }
   0xb   :  { %302 = dma.done.wait [#allocation6], 256  }
   0xc   :  { %303 = vsyncadd [#allocation6], 4294967040  ;;  %v47_v0 = vld [vmem:[#allocation2] sm:$0xff]  ;;  %vm49_vm0 = vcmask 261120   ;;  %v168_v3 = vld [vmem:[#allocation5 + $0x8] sm:$0xff]  ;;  %s312_s0 = smov [#allocation7]  }
   0xd   :  { %v48_v1 = vmul.f32 %v47_v0, %v47_v0  ;;  %91 = vmatpush.bf16.msra.mxu0 %v168_v3  ;;  %v167_v4 = vld [vmem:[#allocation5] sm:$0xff]  ;;  %s114_s1 = sshll.u32 %s312_s0, 4  ;;  %s116_s29 = sshll.u32 %s364_s2, 4  ;;  %vm98_vm4 = vcmask 130048   ;;  %s115_s1 = int_to_ptr.vmem [resolvable:$true] %s114_s1  ;;  %s117_s29 = int_to_ptr.hbm [resolvable:$true] %s116_s29 }
   0xe   :  { %s313_s30 = smov 96   ;;  %s314_s5 = smov 112  }
   0xf   :  { %v50_v2 = vsel %vm49_vm0, %v48_v1, 0.0  ;;  %s315_s6 = smov [#allocation8]   ;;  %s127_s10 = sshll.u32 %s365_s3, 4  ;;  %s128_s10 = int_to_ptr.hbm [resolvable:$true] %s127_s10 }
  0x10   :  { %51 = vadd.xlane.f32.xlu0 %v50_v2  ;;  %s125_s7 = sshll.u32 %s315_s6, 4  ;;  %s316_s11 = smov [#allocation10]   ;;  %s126_s7 = int_to_ptr.vmem [resolvable:$true] %s125_s7 }
  0x11   :  { %92 = vmatpush.bf16.msra.mxu0 %v167_v4  ;;  %s136_s2 = sshll.u32 %s316_s11, 4  ;;  %s138_s14 = sshll.u32 %s366_s4, 4  ;;  %s137_s2 = int_to_ptr.vmem [resolvable:$true] %s136_s2  ;;  %s139_s14 = int_to_ptr.hbm [resolvable:$true] %s138_s14 }
  0x83   :  { %v52_v5 = vpop.xlane.xlu0 %51 }
  0x84   :  { %v53_v6 = vmax.f32 %v52_v5, 1e-24 }
  0x86   :  { %178 = vrsqrt.f32 %v53_v6  ;;  %vm60_vm2 = vweird.f32 %v53_v6 }
  0x8c   :  { %v179_v7 = vpop.eup %178 }
  0x8d   :  { %v55_v8 = vmul.f32 %v179_v7, %v53_v6  ;;  %vm61_vm1 = vweird.f32 %v179_v7 }
  0x8e   :  { %vm62_vm3 = vmor %vm60_vm2, %vm61_vm1 }
  0x8f   :  { %v56_v9 = vmul.f32 %v179_v7, %v55_v8 }
  0x91   :  { %v57_v10 = vmul.f32 0.5, %v56_v9 }
  0x93   :  { %v58_v11 = vsub.f32 1.5, %v57_v10 }
  0x95   :  { %v59_v12 = vmul.f32 %v179_v7, %v58_v11 }
  0x97   :  { %v63_v13 = vsel %vm62_vm3, %v179_v7, %v59_v12 }
  0x98   :  { %v64_v14 = vmul.f32 %v63_v13, %v47_v0 }
  0x9a   :  { %v65_v15 = vpack.c.bf16 %v64_v14, %v64_v14 }
  0x9c   :  { %166 = vmatmul.msk.bf16.vlgmr.msra.gmra.mxu0 %vm49_vm0, %v65_v15 }
 0x119   :  { %v94_v16 = vpop.f32.mrf.mxu0 }
 0x11a   :  { %105 = vrot.lane.b32.xlu1 %v94_v16, %s313_s30  ;;  %101 = vrot.lane.b32.xlu0 %v94_v16, %s314_s5  ;;  %99 = vst.msk [vmem:[#allocation7] sm:$0xff] %vm98_vm4, %v94_v16 }
 0x11b   :  { %119 = dma.vmem_to_hbm [thread:$0]  %s115_s1, 128, %s117_s29, [#allocation4]  }
 0x121   :  { %v96_v17 = vpop.f32.mrf.mxu0 }
 0x18c   :  { %v106_v18 = vpop.permute.xlu1 %105  ;;  %v102_v19 = vpop.permute.xlu0 %101 }
 0x18d   :  { %108 = vst.msk [vmem:[#allocation10] sm:$0xff] %vm98_vm4, %v106_v18 }
 0x18e   :  { %104 = vst.msk [vmem:[#allocation8] sm:$0xff] %vm98_vm4, %v102_v19 }
 0x18f   :  { %130 = dma.vmem_to_hbm [thread:$0]  %s126_s7, 128, %s128_s10, [#allocation9]  }
 0x190   :  { %141 = dma.vmem_to_hbm [thread:$0]  %s137_s2, 128, %s139_s14, [#allocation9]  }
 0x191   :  { %304 = dma.done.wait [#allocation4], 128  }
 0x192   :  { %305 = vsyncadd [#allocation4], 4294967168 }
 0x193   :  { %306 = dma.done.wait [#allocation9], 256  }
 0x194   :  { %307 = vsyncadd [#allocation9], 4294967040 }
 0x195   :  { %154 = vsyncpa [#allocation3], 1 }
 0x196   :  { %155 = vsyncpa [#allocation6], 1 }
 0x197   :  { %156 = vsyncpa [#allocation4], 1 }
 0x198   :  { %157 = vsyncpa [#allocation9], 1 }

</bundles_post_ra>
